<compile_context>
chip_gen: v5e
topology: v5e:2x2
jax: 0.10.0
libtpu: 0.0.40
codegen_flags: <defaults>
</compile_context>

<pallas_src>
import functools

import jax
import jax.numpy as jnp
from jax.experimental import pallas as pl
from jax.experimental.pallas import tpu as pltpu

_LANES = 128
_MAX_BLOCK_ROWS = 2048   # (2048,128) f32 block = 1 MiB; x2 inputs x2 buffers = 4 MiB VMEM.
_MIN_SPLIT_ROWS = 64     # above this, force >=2 grid steps (v7x megacore sharding).


def _cdiv(a, b):
    return -(-a // b)


def _round_up(a, b):
    return _cdiv(a, b) * b


def _integer_power(q, n):
    """q**n for a static non-negative integer n via repeated squaring (VPU-only)."""
    if n == 0:
        return jnp.ones_like(q)
    acc = None
    base = q
    while n:
        if n & 1:
            acc = base if acc is None else acc * base
        n >>= 1
        if n:
            base = base * base
    return acc


def _focal_elementwise(x, t, gamma, binary_targets):
    """Per-element focal term (1-p)^gamma * loss; all math in f32 vregs."""
    if binary_targets:
        # Fast path (exact for t in {0,1}): one exp + log1p + approx reciprocal.
        z = (2.0 * t - 1.0) * x
        e = jnp.exp(-jnp.abs(z))
        loss = jnp.maximum(-z, 0.0) + jnp.log1p(e)
        probs = jnp.where(z >= 0.0, 1.0, e) * pl.reciprocal(1.0 + e, approx=True)
    else:
        # General (soft-target) path; matches torch.nn.BCEWithLogitsLoss:
        #   loss = max(x,0) - x*t + log1p(exp(-|x|)); probs = exp(-loss)
        loss = jnp.maximum(x, 0.0) - x * t + jnp.log1p(jnp.exp(-jnp.abs(x)))
        probs = jnp.exp(-loss)

    q = 1.0 - probs
    g = float(gamma)
    if g.is_integer() and 0.0 <= g <= 64.0:
        weight = _integer_power(q, int(g))   # gamma=2 -> q*q, no pow transcendentals
    else:
        # TODO(synk): non-integer gamma falls back to float pow (exp/log on EUP).
        weight = q ** g
    return weight * loss


def _focal_kernel(x_ref, t_ref, o_ref, *, gamma, n_rows, block_rows,
                  needs_row_mask, binary_targets):
    x = x_ref[...].astype(jnp.float32)
    t = t_ref[...].astype(jnp.float32)
    focal = _focal_elementwise(x, t, gamma, binary_targets)

    def _row_sum(v):
        # (1,128) lane-partial: reduce over rows only (no cross-lane XLU pass,
        # no SMEM scalar store); lane-dense unmasked vst.
        return jnp.sum(v, axis=0, keepdims=True)

    if needs_row_mask:
        i = pl.program_id(0)
        last = pl.num_programs(0) - 1

        @pl.when(i != last)
        def _():
            o_ref[...] = _row_sum(focal)

        @pl.when(i == last)
        def _():
            # Only whole rows can be out of bounds (lane padding is handled in
            # the wrapper); mask them, then reduce exactly once.
            rows = jax.lax.broadcasted_iota(jnp.int32, focal.shape, 0) + i * block_rows
            o_ref[...] = _row_sum(jnp.where(rows < n_rows, focal, 0.0))
    else:
        o_ref[...] = _row_sum(focal)


def _focal_sum_jax(x, t, gamma):
    """Plain-JAX focal sum for the tiny (<128 element) unaligned tail."""
    x = x.astype(jnp.float32)
    t = t.astype(jnp.float32)
    loss = jnp.maximum(x, 0.0) - x * t + jnp.log1p(jnp.exp(-jnp.abs(x)))
    probs = jnp.exp(-loss)
    return jnp.sum((1.0 - probs) ** float(gamma) * loss)


def binary_focal_loss_with_logits(inputs, targets, alpha=1.0, gamma=2.0,
                                  binary_targets=False):
    """Pallas TPU implementation of BinaryFocalLossWithLogits.forward (mean reduction).

    Set binary_targets=True when targets are hard 0/1 labels to use a cheaper
    (one fewer exp per element) but mathematically identical formulation.
    """
    assert inputs.shape == targets.shape
    total = int(inputs.size)
    assert total > 0

    # Free row-major flatten; inputs keep their native dtype (bf16 ok) in HBM.
    x_flat = inputs.reshape(-1)
    t_flat = targets.reshape(-1)

    aligned = total - (total % _LANES)
    n_rows = aligned // _LANES

    # <=127 trailing elements that don't fill a lane row: fold them in with
    # plain JAX instead of jnp.pad-copying both full arrays (ragged sizes only).
    if aligned != total:
        tail_sum = _focal_sum_jax(x_flat[aligned:], t_flat[aligned:], gamma)
    else:
        tail_sum = jnp.float32(0.0)

    if n_rows == 0:
        return tail_sum * (float(alpha) / float(total))

    x2 = x_flat[:aligned].reshape(n_rows, _LANES)
    t2 = t_flat[:aligned].reshape(n_rows, _LANES)

    # Block choice:
    #  * tiny inputs -> one block equal to the full array (no sublane constraint)
    #  * otherwise   -> aim for >= 2 grid steps (so the "parallel" axis shards
    #    across both v7x TensorCores), block_rows a multiple of 8, capped at
    #    _MAX_BLOCK_ROWS to amortize the ~0.35us/step overhead while keeping
    #    2 inputs x 2 pipeline buffers at 4 MiB of VMEM.
    if n_rows < _MIN_SPLIT_ROWS:
        block_rows = n_rows
    else:
        block_rows = min(_MAX_BLOCK_ROWS, _round_up(_cdiv(n_rows, 2), 8))
    grid_n = _cdiv(n_rows, block_rows)
    needs_row_mask = (grid_n * block_rows) != n_rows

    kernel = functools.partial(
        _focal_kernel,
        gamma=float(gamma),
        n_rows=n_rows,
        block_rows=block_rows,
        needs_row_mask=needs_row_mask,
        binary_targets=bool(binary_targets),
    )

    partials = pl.pallas_call(
        kernel,
        out_shape=jax.ShapeDtypeStruct((1, grid_n * _LANES), jnp.float32),
        grid=(grid_n,),
        in_specs=[
            pl.BlockSpec((block_rows, _LANES), lambda i: (i, 0)),
            pl.BlockSpec((block_rows, _LANES), lambda i: (i, 0)),
        ],
        # Each step writes its own lane-dense (1,128) partial row-chunk.
        out_specs=pl.BlockSpec((1, _LANES), lambda i: (0, i)),
        compiler_params=pltpu.CompilerParams(dimension_semantics=("parallel",)),
    )(x2, t2)

    # Tiny final reduction + mean + scalar alpha (the module multiplies by a
    # scalar alpha, not the per-class alpha_t variant).
    return (jnp.sum(partials) + tail_sum) * (float(alpha) / float(total))


def _reference(inputs, targets, alpha=1.0, gamma=2.0):
    x = inputs.astype(jnp.float32)
    t = targets.astype(jnp.float32)
    loss = jnp.maximum(x, 0.0) - x * t + jnp.log1p(jnp.exp(-jnp.abs(x)))
    probs = jnp.exp(-loss)
    return jnp.mean(alpha * (1.0 - probs) ** gamma * loss)


if __name__ == "__main__":
    key = jax.random.PRNGKey(0)
    keys = jax.random.split(key, 10)

    # 1) Primary: NCHW (2,4,16,16) f32, lane-aligned, single block.
    shape = (2, 4, 16, 16)
    x = jax.random.normal(keys[0], shape, dtype=jnp.float32) * 2.0
    t = jax.random.bernoulli(keys[1], p=0.5, shape=shape).astype(jnp.float32)
    out = jax.block_until_ready(binary_focal_loss_with_logits(x, t, alpha=1.0, gamma=2.0))
    ref = _reference(x, t, alpha=1.0, gamma=2.0)
    assert jnp.allclose(out, ref, rtol=1e-5, atol=1e-6), (out, ref)

    # 1b) Same data through the binary-target fast path (approx reciprocal).
    out_fast = jax.block_until_ready(
        binary_focal_loss_with_logits(x, t, alpha=1.0, gamma=2.0, binary_targets=True))
    assert jnp.allclose(out_fast, ref, rtol=5e-3, atol=1e-5), (out_fast, ref)

    # 2) Ragged tiny shape (105 elements): pure-JAX tail path, no pallas_call.
    shape_r = (3, 5, 7)
    x_r = jax.random.normal(keys[2], shape_r, dtype=jnp.float32)
    t_r = jax.random.bernoulli(keys[3], p=0.3, shape=shape_r).astype(jnp.float32)
    out_r = jax.block_until_ready(
        binary_focal_loss_with_logits(x_r, t_r, alpha=0.25, gamma=2.0))
    ref_r = _reference(x_r, t_r, alpha=0.25, gamma=2.0)
    assert jnp.allclose(out_r, ref_r, rtol=1e-5, atol=1e-6), (out_r, ref_r)

    # 3) Ragged with aligned head + tail (1001 elements = 7 full rows + 105 tail).
    shape_ht = (13, 77)
    x_ht = jax.random.normal(keys[4], shape_ht, dtype=jnp.float32)
    t_ht = jax.random.bernoulli(keys[5], p=0.5, shape=shape_ht).astype(jnp.float32)
    out_ht = jax.block_until_ready(
        binary_focal_loss_with_logits(x_ht, t_ht, alpha=0.5, gamma=3.0))
    ref_ht = _reference(x_ht, t_ht, alpha=0.5, gamma=3.0)
    assert jnp.allclose(out_ht, ref_ht, rtol=1e-5, atol=1e-6), (out_ht, ref_ht)

    # 4) Multi-block grid with a ragged last block (600 rows -> 2 blocks of 304).
    shape_b = (2, 3, 100, 128)
    x_b = jax.random.normal(keys[6], shape_b, dtype=jnp.float32) * 3.0
    t_b = jax.random.bernoulli(keys[7], p=0.5, shape=shape_b).astype(jnp.float32)
    out_b = jax.block_until_ready(
        binary_focal_loss_with_logits(x_b, t_b, alpha=1.0, gamma=2.0))
    ref_b = _reference(x_b, t_b, alpha=1.0, gamma=2.0)
    assert jnp.allclose(out_b, ref_b, rtol=1e-5, atol=1e-6), (out_b, ref_b)

    # 5) bf16 inputs stay bf16 in HBM; kernel upcasts in VMEM only.
    x_h = (jax.random.normal(keys[8], shape, dtype=jnp.float32) * 2.0).astype(jnp.bfloat16)
    t_h = jax.random.bernoulli(keys[9], p=0.5, shape=shape).astype(jnp.bfloat16)
    out_h = jax.block_until_ready(
        binary_focal_loss_with_logits(x_h, t_h, alpha=1.0, gamma=2.0))
    ref_h = _reference(x_h, t_h, alpha=1.0, gamma=2.0)
    assert jnp.allclose(out_h, ref_h, rtol=1e-5, atol=1e-6), (out_h, ref_h)

    print("KERNEL_OK")
</pallas_src>

<mosaic_0001>
module attributes {stable_mosaic.version = 11 : i64} {
  func.func @_focal_kernel(%arg0: i32, %arg1: memref<16x128xf32, #tpu.memory_space<vmem>>, %arg2: memref<16x128xf32, #tpu.memory_space<vmem>>, %arg3: memref<1x128xf32, #tpu.memory_space<vmem>>) attributes {dimension_semantics = [#tpu.dimension_semantics<parallel>], iteration_bounds = array<i64: 1>, scalar_prefetch = 0 : i64, scratch_operands = 0 : i64, tpu.core_type = #tpu.core_type<tc>, window_params = [{transform_indices = @transform_0, window_bounds = array<i64: 16, 128>}, {transform_indices = @transform_1, window_bounds = array<i64: 16, 128>}, {transform_indices = @transform_2, window_bounds = array<i64: 1, 128>}]} {
    %c0 = arith.constant 0 : index
    %c0_0 = arith.constant 0 : index
    %0 = vector.load %arg1[%c0, %c0_0] : memref<16x128xf32, #tpu.memory_space<vmem>>, vector<16x128xf32>
    %c0_1 = arith.constant 0 : index
    %c0_2 = arith.constant 0 : index
    %1 = vector.load %arg2[%c0_1, %c0_2] : memref<16x128xf32, #tpu.memory_space<vmem>>, vector<16x128xf32>
    %cst = arith.constant 0.000000e+00 : f32
    %2 = vector.broadcast %cst : f32 to vector<16x128xf32>
    %3 = arith.maximumf %0, %2 : vector<16x128xf32>
    %4 = arith.mulf %0, %1 : vector<16x128xf32>
    %5 = arith.subf %3, %4 : vector<16x128xf32>
    %6 = math.absf %0 : vector<16x128xf32>
    %cst_3 = arith.constant 0.000000e+00 : f32
    %7 = vector.broadcast %cst_3 : f32 to vector<16x128xf32>
    %8 = arith.subf %7, %6 : vector<16x128xf32>
    %9 = math.exp %8 : vector<16x128xf32>
    %10 = math.log1p %9 : vector<16x128xf32>
    %11 = arith.addf %5, %10 : vector<16x128xf32>
    %cst_4 = arith.constant 0.000000e+00 : f32
    %12 = vector.broadcast %cst_4 : f32 to vector<16x128xf32>
    %13 = arith.subf %12, %11 : vector<16x128xf32>
    %14 = math.exp %13 : vector<16x128xf32>
    %cst_5 = arith.constant 1.000000e+00 : f32
    %15 = vector.broadcast %cst_5 : f32 to vector<16x128xf32>
    %16 = arith.subf %15, %14 : vector<16x128xf32>
    %17 = arith.mulf %16, %16 : vector<16x128xf32>
    %18 = arith.mulf %17, %11 : vector<16x128xf32>
    %cst_6 = arith.constant dense<0.000000e+00> : vector<128xf32>
    %19 = vector.multi_reduction <add>, %18, %cst_6 [0] : vector<16x128xf32> to vector<128xf32>
    %20 = vector.shape_cast %19 : vector<128xf32> to vector<1x128xf32>
    %c0_7 = arith.constant 0 : index
    %c0_8 = arith.constant 0 : index
    %21 = vector.load %arg3[%c0_7, %c0_8] : memref<1x128xf32, #tpu.memory_space<vmem>>, vector<1x128xf32>
    tpu.vector_store %arg3[%c0_7, %c0_8], %20 {strides = array<i32>} : memref<1x128xf32, #tpu.memory_space<vmem>>, vector<1x128xf32>,
    return
  }
  func.func @transform_0(%arg0: i32) -> (i32, i32) {
    %c0_i32 = arith.constant 0 : i32
    %c0_i32_0 = arith.constant 0 : i32
    return %arg0, %c0_i32 : i32, i32
  }
  func.func @transform_1(%arg0: i32) -> (i32, i32) {
    %c0_i32 = arith.constant 0 : i32
    %c0_i32_0 = arith.constant 0 : i32
    return %arg0, %c0_i32 : i32, i32
  }
  func.func @transform_2(%arg0: i32) -> (i32, i32) {
    %c0_i32 = arith.constant 0 : i32
    %c0_i32_0 = arith.constant 0 : i32
    return %c0_i32, %arg0 : i32, i32
  }
}

</mosaic_0001>

<bundles_post_ra>
// kernel: tpu_custom_call.1
= control target key start
LH: loop header
LB: loop body
LE: loop exit
PB: predicated region body
PF: predicated region fallthrough
CT: control target
= control target key end

     0   :  { %7 = vsyncpa [#allocation3], 0  ;;  %s244_s0 = inlined_call_operand.hbm [shape: f32[16,128], index: 0, kind: input, shape index: {}]   ;;  %s245_s1 = inlined_call_operand.hbm [shape: f32[16,128], index: 1, kind: input, shape index: {}]   ;;  %s246_s2 = inlined_call_operand.hbm [shape: f32[1,128], index: 2, kind: output, shape index: {}]  }
   0x1   :  { %8 = vsyncpa [#allocation6], 0 }
   0x2   :  { %9 = vsyncpa [#allocation4], 0  ;;  %s14_s11 = sshll.u32 %s244_s0, 4  ;;  %s215_s12 = smov [#allocation2]   ;;  %s15_s11 = int_to_ptr.hbm [resolvable:$true] %s14_s11 }
   0x3   :  { %s16_s13 = sshll.u32 %s215_s12, 4  ;;  %s27_s16 = sshll.u32 %s245_s1, 4  ;;  %s17_s13 = int_to_ptr.vmem [resolvable:$true] %s16_s13  ;;  %s28_s16 = int_to_ptr.hbm [resolvable:$true] %s27_s16 }
   0x4   :  { %s216_s17 = smov 128   ;;  %s217_s18 = smov 8  }
   0x5   :  { %22 = dma.hbm_to_vmem [thread:$0]  %s15_s11, 256, %s17_s13, [#allocation3], %s216_s17, %s216_s17, %s217_s18  }
   0x6   :  { %s218_s19 = smov [#allocation5]  }
   0x7   :  { %s29_s20 = sshll.u32 %s218_s19, 4  ;;  %s30_s20 = int_to_ptr.vmem [resolvable:$true] %s29_s20 }
   0x8   :  { %35 = dma.hbm_to_vmem [thread:$0]  %s28_s16, 256, %s30_s20, [#allocation6], %s216_s17, %s216_s17, %s217_s18  }
   0x9   :  { %209 = dma.done.wait [#allocation3], 256  }
   0xa   :  { %210 = vsyncadd [#allocation3], 4294967040 }
   0xb   :  { %211 = dma.done.wait [#allocation6], 256  }
   0xc   :  { %212 = vsyncadd [#allocation6], 4294967040  ;;  %v44_v0 = vld [vmem:[#allocation2] sm:$0xff]  ;;  %v45_v1 = vld [vmem:[#allocation2 + $0x8] sm:$0xff]  ;;  %s219_s0 = smov [#allocation7]   ;;  %s109_s23 = sshll.u32 %s246_s2, 4  ;;  %s110_s23 = int_to_ptr.hbm [resolvable:$true] %s109_s23 }
   0xd   :  { %v54_v2 = vand.u32 2147483647, %v44_v0  ;;  %v55_v3 = vand.u32 2147483647, %v45_v1  ;;  %v46_v12 = vld [vmem:[#allocation5] sm:$0xff]  ;;  %v47_v15 = vld [vmem:[#allocation5 + $0x8] sm:$0xff] }
   0xe   :  { %v48_v17 = vmax.f32 %v44_v0, 0.0  ;;  %v50_v18 = vmul.f32 %v46_v12, %v44_v0  ;;  %v49_v21 = vmax.f32 %v45_v1, 0.0  ;;  %v51_v22 = vmul.f32 %v47_v15, %v45_v1  ;;  %s107_s1 = sshll.u32 %s219_s0, 4  ;;  %s108_s1 = int_to_ptr.vmem [resolvable:$true] %s107_s1 }
   0xf   :  { %v56_v4 = vsub.f32 0.0, %v54_v2  ;;  %v57_v5 = vsub.f32 0.0, %v55_v3 }
  0x10   :  { %v52_v26 = vsub.f32 %v48_v17, %v50_v18  ;;  %v53_v29 = vsub.f32 %v49_v21, %v51_v22 }
  0x11   :  { %v58_v6 = vmul.f32 1.442695, %v56_v4  ;;  %v60_v7 = vmul.f32 1.442695, %v57_v5 }
  0x13   :  { %125 = vpow2.f32 %v58_v6 }
  0x14   :  { %127 = vpow2.f32 %v60_v7 }
  0x19   :  { %v126_v8 = vpop.eup %125 }
  0x1a   :  { %v128_v9 = vpop.eup %127  ;;  %v62_v10 = vadd.f32 1.0, %v126_v8  ;;  %v65_v11 = vmul.f32 -0.5, %v126_v8  ;;  %v68_v19 = vand.u32 2147483647, %v126_v8 }
  0x1b   :  { %v71_v13 = vadd.f32 1.0, %v128_v9  ;;  %v74_v14 = vmul.f32 -0.5, %v128_v9  ;;  %v77_v23 = vand.u32 2147483647, %v128_v9 }
  0x1c   :  { %129 = vlog2.f32 %v62_v10  ;;  %v66_v16 = vadd.f32 1.0, %v65_v11  ;;  %vm69_vm0 = vcmp.lt.f32.partialorder %v68_v19, 0.0004427343 }
  0x1d   :  { %131 = vlog2.f32 %v71_v13  ;;  %v75_v20 = vadd.f32 1.0, %v74_v14  ;;  %vm78_vm1 = vcmp.lt.f32.partialorder %v77_v23, 0.0004427343 }
  0x1e   :  { %v67_v24 = vmul.f32 %v126_v8, %v66_v16 }
  0x1f   :  { %v76_v27 = vmul.f32 %v128_v9, %v75_v20 }
  0x22   :  { %v130_v25 = vpop.eup %129 }
  0x23   :  { %v132_v28 = vpop.eup %131  ;;  %v64_v30 = vmul.f32 0.6931472, %v130_v25 }
  0x24   :  { %v73_v31 = vmul.f32 0.6931472, %v132_v28 }
  0x25   :  { %v70_v32 = vsel %vm69_vm0, %v67_v24, %v64_v30 }
  0x26   :  { %v79_v33 = vsel %vm78_vm1, %v76_v27, %v73_v31  ;;  %v80_v34 = vadd.f32 %v70_v32, %v52_v26 }
  0x27   :  { %v81_v35 = vadd.f32 %v79_v33, %v53_v29 }
  0x28   :  { %v82_v36 = vsub.f32 0.0, %v80_v34 }
  0x29   :  { %v83_v37 = vsub.f32 0.0, %v81_v35 }
  0x2a   :  { %v84_v38 = vmul.f32 1.442695, %v82_v36 }
  0x2b   :  { %v86_v39 = vmul.f32 1.442695, %v83_v37 }
  0x2c   :  { %133 = vpow2.f32 %v84_v38 }
  0x2d   :  { %135 = vpow2.f32 %v86_v39 }
  0x32   :  { %v134_v40 = vpop.eup %133 }
  0x33   :  { %v136_v41 = vpop.eup %135  ;;  %v88_v42 = vsub.f32 1.0, %v134_v40 }
  0x34   :  { %v89_v43 = vsub.f32 1.0, %v136_v41 }
  0x35   :  { %v90_v44 = vmul.f32 %v88_v42, %v88_v42 }
  0x36   :  { %v91_v45 = vmul.f32 %v89_v43, %v89_v43 }
  0x37   :  { %v92_v46 = vmul.f32 %v90_v44, %v80_v34 }
  0x38   :  { %v93_v47 = vmul.f32 %v91_v45, %v81_v35 }
  0x3a   :  { %v94_v48 = vadd.f32 %v93_v47, %v92_v46 }
  0x3c   :  { %v95_v49 = vrot.slane %v94_v48, 4 }
  0x3e   :  { %v96_v50 = vadd.f32 %v95_v49, %v94_v48 }
  0x40   :  { %v97_v51 = vrot.slane %v96_v50, 2 }
  0x42   :  { %v98_v52 = vadd.f32 %v97_v51, %v96_v50 }
  0x44   :  { %v99_v53 = vrot.slane %v98_v52, 1 }
  0x46   :  { %v100_v54 = vadd.f32 %v99_v53, %v98_v52 }
  0x48   :  { %101 = vst [vmem:[#allocation7] sm:$0x1] %v100_v54 }
  0x49   :  { %112 = dma.vmem_to_hbm [thread:$0]  %s108_s1, 16, %s110_s23, [#allocation4]  }
  0x4a   :  { %213 = dma.done.wait [#allocation4], 16  }
  0x4b   :  { %214 = vsyncadd [#allocation4], 4294967280 }
  0x4c   :  { %117 = vsyncpa [#allocation3], 1 }
  0x4d   :  { %118 = vsyncpa [#allocation6], 1 }
  0x4e   :  { %119 = vsyncpa [#allocation4], 1 }

</bundles_post_ra>
